<compile_context>
chip_gen: v6e
topology: v6e:2x2x1
jax: 0.10.0
libtpu: 0.0.40
codegen_flags: <defaults>
</compile_context>

<pallas_src>
import jax
import jax.numpy as jnp
from jax.experimental import pallas as pl
from jax.experimental.pallas import tpu as pltpu


def _embed_kernel(x_ref, w1_ref, w2_ref, b_ref, o_ref):
    # x_ref : (TB, input_dim)       VMEM, f32
    # w1_ref: (input_dim, emb_dim)  VMEM, pre-transposed (bf16 by default)
    # w2_ref: (emb_dim, emb_dim)    VMEM, pre-transposed (bf16 by default)
    # b_ref : (2, emb_dim)          VMEM, f32 (row 0 = b1, row 1 = b2)
    # o_ref : (TB, emb_dim)         VMEM, natural width (last dim == full dim)
    x = x_ref[...].astype(jnp.float32)
    b1 = b_ref[0:1, :].astype(jnp.float32)
    b2 = b_ref[1:2, :].astype(jnp.float32)

    input_dim = x_ref.shape[1]
    if input_dim <= 8:
        # Layer 1 on the VPU: K is tiny (4), so a matmul would be padded to
        # the MXU's full systolic depth at ~2% utilization.  Do it as
        # input_dim broadcast-FMAs and keep the MXU free for layer 2.
        w1f = w1_ref[...].astype(jnp.float32)
        h = b1 + x[:, 0:1] * w1f[0:1, :]
        for k in range(1, input_dim):
            h = h + x[:, k:k + 1] * w1f[k:k + 1, :]
    else:
        h = jnp.dot(x.astype(w1_ref.dtype), w1_ref[...],
                    preferred_element_type=jnp.float32) + b1
    h = jnp.maximum(h, 0.0)                                   # ReLU

    # Layer 2 on the MXU, bf16 operands, f32 accumulation.
    y = jnp.dot(h.astype(w2_ref.dtype), w2_ref[...],
                preferred_element_type=jnp.float32) + b2
    o_ref[...] = y.astype(o_ref.dtype)


def prepare_embed_params(w1, b1, w2, b2, param_dtype=jnp.bfloat16):
    """One-time layout/dtype transform (run once, outside the hot path).

    Inputs are PyTorch nn.Linear parameters:
      w1: (emb_dim, input_dim), b1: (emb_dim,), w2: (emb_dim, emb_dim), b2: (emb_dim,)
    Returns:
      w1p: (input_dim, emb_dim)   transposed, cast to param_dtype
      w2p: (emb_dim, emb_dim)     transposed, cast to param_dtype
      bp : (2, emb_dim)           both biases merged (one DMA), kept f32
    """
    w1p = jnp.transpose(w1).astype(param_dtype)
    w2p = jnp.transpose(w2).astype(param_dtype)
    bp = jnp.stack([b1, b2], axis=0).astype(jnp.float32)
    return w1p, w2p, bp


def embed_block_forward(x, w1p, w2p, bp, *, batch_tile=2048):
    """Pallas implementation of EmbedBlock.forward.

    x: any shape whose flatten gives (-1, input_dim); params from
    prepare_embed_params().  Returns (B, emb_dim, 1, 1) in x's dtype.
    """
    input_dim, emb_dim = w1p.shape
    x2d = x.reshape(-1, input_dim)            # input.view(-1, input_dim)
    B = x2d.shape[0]
    out_dtype = x2d.dtype

    if B <= batch_tile:
        # Small batch: single invocation, no grid loop -> no per-step grid
        # overhead.  Default BlockSpecs place the full (tiny) arrays in VMEM.
        # TODO(synk): at tiny B this standalone call is pure launch + weight-
        # DMA latency; in production fuse EmbedBlock into the surrounding
        # UNet kernel or keep the ~2 KiB of weights VMEM-resident across
        # calls (cross-call prefetch, P10) instead of re-DMAing them.
        out2d = pl.pallas_call(
            _embed_kernel,
            out_shape=jax.ShapeDtypeStruct((B, emb_dim), out_dtype),
        )(x2d, w1p, w2p, bp)
    else:
        # Large batch: tile the batch axis so x/out DMA double-buffers against
        # compute.  Weights/biases stay VMEM-resident (index_map -> (0, 0)).
        # "parallel" lets v7x split tiles across its two TensorCores.
        out2d = pl.pallas_call(
            _embed_kernel,
            out_shape=jax.ShapeDtypeStruct((B, emb_dim), out_dtype),
            grid=(pl.cdiv(B, batch_tile),),
            in_specs=[
                pl.BlockSpec((batch_tile, input_dim), lambda i: (i, 0)),
                pl.BlockSpec((input_dim, emb_dim), lambda i: (0, 0)),
                pl.BlockSpec((emb_dim, emb_dim), lambda i: (0, 0)),
                pl.BlockSpec((2, emb_dim), lambda i: (0, 0)),
            ],
            out_specs=pl.BlockSpec((batch_tile, emb_dim), lambda i: (i, 0)),
            compiler_params=pltpu.CompilerParams(
                dimension_semantics=("parallel",),
            ),
        )(x2d, w1p, w2p, bp)

    # nn.Unflatten(1, (emb_dim, 1, 1)) -> (B, emb_dim, 1, 1)
    return out2d.reshape(B, emb_dim, 1, 1)


def _ref_forward(x, w1, b1, w2, b2):
    """Pure-JAX f32 reference mirroring the PyTorch module (PyTorch layouts)."""
    emb_dim, input_dim = w1.shape
    x2d = x.reshape(-1, input_dim)
    h = jnp.maximum(x2d @ w1.T + b1, 0.0)
    y = h @ w2.T + b2
    return y.reshape(-1, emb_dim, 1, 1)


if __name__ == "__main__":
    # Small shapes consistent with the module: batch=2, input_dim=4, emb_dim=32.
    input_dim = 4
    emb_dim = 32
    batch = 2

    key = jax.random.PRNGKey(0)
    kx, kw1, kb1, kw2, kb2 = jax.random.split(key, 5)

    # Deterministic synthetic parameters (PyTorch Linear layout: (out, in)).
    x = jax.random.normal(kx, (batch, input_dim, 1, 1), dtype=jnp.float32)
    w1 = jax.random.normal(kw1, (emb_dim, input_dim), dtype=jnp.float32) * 0.1
    b1 = jax.random.normal(kb1, (emb_dim,), dtype=jnp.float32) * 0.1
    w2 = jax.random.normal(kw2, (emb_dim, emb_dim), dtype=jnp.float32) * 0.1
    b2 = jax.random.normal(kb2, (emb_dim,), dtype=jnp.float32) * 0.1

    # One-time parameter layout/dtype transform (outside the hot path).
    w1p, w2p, bp = prepare_embed_params(w1, b1, w2, b2)
    w1p, w2p, bp = jax.block_until_ready((w1p, w2p, bp))

    # bf16 weights vs the f32 reference -> relaxed (but tight-enough) tolerance.
    tol = dict(atol=2e-2, rtol=2e-2)

    # 1) Small-batch (single call, no grid) path.
    out = jax.block_until_ready(embed_block_forward(x, w1p, w2p, bp))
    ref = _ref_forward(x, w1, b1, w2, b2)
    assert out.shape == (batch, emb_dim, 1, 1), out.shape
    assert jnp.allclose(out, ref, **tol), "mismatch vs reference (small batch)"

    # 2) Large batch: batch-tiled "parallel" grid (2 clean tiles of 2048).
    xb = jax.random.normal(jax.random.PRNGKey(1), (4096, input_dim), dtype=jnp.float32)
    out_b = jax.block_until_ready(embed_block_forward(xb, w1p, w2p, bp))
    ref_b = _ref_forward(xb, w1, b1, w2, b2)
    assert out_b.shape == (4096, emb_dim, 1, 1), out_b.shape
    assert jnp.allclose(out_b, ref_b, **tol), "mismatch vs reference (tiled)"

    # 3) Ragged last tile (B % batch_tile != 0): rows are independent, so the
    #    masked final block must leave all valid rows correct.
    xr = jax.random.normal(jax.random.PRNGKey(2), (1000, input_dim), dtype=jnp.float32)
    out_r = jax.block_until_ready(
        embed_block_forward(xr, w1p, w2p, bp, batch_tile=256))
    ref_r = _ref_forward(xr, w1, b1, w2, b2)
    assert out_r.shape == (1000, emb_dim, 1, 1), out_r.shape
    assert jnp.allclose(out_r, ref_r, **tol), "mismatch vs reference (ragged)"

    print("KERNEL_OK")
</pallas_src>

<mosaic_0001>
module attributes {stable_mosaic.version = 11 : i64} {
  func.func @_embed_kernel(%arg0: memref<2x4xf32, #tpu.memory_space<vmem>>, %arg1: memref<4x32xbf16, #tpu.memory_space<vmem>>, %arg2: memref<32x32xbf16, #tpu.memory_space<vmem>>, %arg3: memref<2x32xf32, #tpu.memory_space<vmem>>, %arg4: memref<2x32xf32, #tpu.memory_space<vmem>>) attributes {dimension_semantics = [], scalar_prefetch = 0 : i64, scratch_operands = 0 : i64, tpu.core_type = #tpu.core_type<tc>} {
    %c0 = arith.constant 0 : index
    %c0_0 = arith.constant 0 : index
    %0 = vector.load %arg0[%c0, %c0_0] : memref<2x4xf32, #tpu.memory_space<vmem>>, vector<2x4xf32>
    %c0_1 = arith.constant 0 : index
    %c0_2 = arith.constant 0 : index
    %1 = vector.load %arg3[%c0_1, %c0_2] : memref<2x32xf32, #tpu.memory_space<vmem>>, vector<1x32xf32>
    %c1 = arith.constant 1 : index
    %c0_3 = arith.constant 0 : index
    %2 = vector.load %arg3[%c1, %c0_3] : memref<2x32xf32, #tpu.memory_space<vmem>>, vector<1x32xf32>
    %c0_4 = arith.constant 0 : index
    %c0_5 = arith.constant 0 : index
    %3 = vector.load %arg1[%c0_4, %c0_5] : memref<4x32xbf16, #tpu.memory_space<vmem>>, vector<4x32xbf16>
    %4 = arith.extf %3 : vector<4x32xbf16> to vector<4x32xf32>
    %5 = vector.extract_strided_slice %0 {offsets = [0, 0], sizes = [2, 1], strides = [1, 1]} : vector<2x4xf32> to vector<2x1xf32>
    %6 = vector.extract_strided_slice %4 {offsets = [0, 0], sizes = [1, 32], strides = [1, 1]} : vector<4x32xf32> to vector<1x32xf32>
    %7 = vector.broadcast %5 : vector<2x1xf32> to vector<2x32xf32>
    %8 = vector.broadcast %6 : vector<1x32xf32> to vector<2x32xf32>
    %9 = arith.mulf %7, %8 : vector<2x32xf32>
    %10 = vector.broadcast %1 : vector<1x32xf32> to vector<2x32xf32>
    %11 = arith.addf %10, %9 : vector<2x32xf32>
    %12 = vector.extract_strided_slice %0 {offsets = [0, 1], sizes = [2, 1], strides = [1, 1]} : vector<2x4xf32> to vector<2x1xf32>
    %13 = vector.extract_strided_slice %4 {offsets = [1, 0], sizes = [1, 32], strides = [1, 1]} : vector<4x32xf32> to vector<1x32xf32>
    %14 = vector.broadcast %12 : vector<2x1xf32> to vector<2x32xf32>
    %15 = vector.broadcast %13 : vector<1x32xf32> to vector<2x32xf32>
    %16 = arith.mulf %14, %15 : vector<2x32xf32>
    %17 = arith.addf %11, %16 : vector<2x32xf32>
    %18 = vector.extract_strided_slice %0 {offsets = [0, 2], sizes = [2, 1], strides = [1, 1]} : vector<2x4xf32> to vector<2x1xf32>
    %19 = vector.extract_strided_slice %4 {offsets = [2, 0], sizes = [1, 32], strides = [1, 1]} : vector<4x32xf32> to vector<1x32xf32>
    %20 = vector.broadcast %18 : vector<2x1xf32> to vector<2x32xf32>
    %21 = vector.broadcast %19 : vector<1x32xf32> to vector<2x32xf32>
    %22 = arith.mulf %20, %21 : vector<2x32xf32>
    %23 = arith.addf %17, %22 : vector<2x32xf32>
    %24 = vector.extract_strided_slice %0 {offsets = [0, 3], sizes = [2, 1], strides = [1, 1]} : vector<2x4xf32> to vector<2x1xf32>
    %25 = vector.extract_strided_slice %4 {offsets = [3, 0], sizes = [1, 32], strides = [1, 1]} : vector<4x32xf32> to vector<1x32xf32>
    %26 = vector.broadcast %24 : vector<2x1xf32> to vector<2x32xf32>
    %27 = vector.broadcast %25 : vector<1x32xf32> to vector<2x32xf32>
    %28 = arith.mulf %26, %27 : vector<2x32xf32>
    %29 = arith.addf %23, %28 : vector<2x32xf32>
    %cst = arith.constant 0.000000e+00 : f32
    %30 = vector.broadcast %cst : f32 to vector<2x32xf32>
    %31 = arith.maximumf %29, %30 : vector<2x32xf32>
    %32 = arith.truncf %31 : vector<2x32xf32> to vector<2x32xbf16>
    %c0_6 = arith.constant 0 : index
    %c0_7 = arith.constant 0 : index
    %33 = vector.load %arg2[%c0_6, %c0_7] : memref<32x32xbf16, #tpu.memory_space<vmem>>, vector<32x32xbf16>
    %cst_8 = arith.constant dense<0.000000e+00> : vector<2x32xf32>
    %34 = tpu.matmul %32, %33, %cst_8 {dimension_numbers = #tpu.dot_dimension_numbers<[1], [0], [0], [1], [0, 0, 1, 1], [], []>} : vector<2x32xbf16>, vector<32x32xbf16>, vector<2x32xf32> -> vector<2x32xf32>
    %35 = vector.broadcast %2 : vector<1x32xf32> to vector<2x32xf32>
    %36 = arith.addf %34, %35 : vector<2x32xf32>
    %c0_9 = arith.constant 0 : index
    %c0_10 = arith.constant 0 : index
    %37 = vector.load %arg4[%c0_9, %c0_10] : memref<2x32xf32, #tpu.memory_space<vmem>>, vector<2x32xf32>
    tpu.vector_store %arg4[%c0_9, %c0_10], %36 {strides = array<i32>} : memref<2x32xf32, #tpu.memory_space<vmem>>, vector<2x32xf32>,
    return
  }
}

</mosaic_0001>

<bundles_post_ra>
// kernel: tpu_custom_call.1
= control target key start
LH: loop header
LB: loop body
LE: loop exit
PB: predicated region body
PF: predicated region fallthrough
CT: control target
= control target key end

     0   :  { %9 = vsyncpa [#allocation3], 0  ;;  %s366_s0 = inlined_call_operand.hbm [shape: f32[2,4], index: 0, kind: input, shape index: {}]   ;;  %s367_s1 = inlined_call_operand.hbm [shape: bf16[4,32], index: 1, kind: input, shape index: {}]   ;;  %s368_s2 = inlined_call_operand.hbm [shape: bf16[32,32], index: 2, kind: input, shape index: {}]   ;;  %s369_s3 = inlined_call_operand.vmem [shape: f32[2,32], index: 3, kind: input, shape index: {}]   ;;  %s370_s4 = inlined_call_operand.hbm [shape: f32[2,32], index: 4, kind: output, shape index: {}]  }
   0x1   :  { %10 = vsyncpa [#allocation6], 0 }
   0x2   :  { %11 = vsyncpa [#allocation4], 0  ;;  %s311_s15 = smov [#allocation5]   ;;  %s312_s17 = smov [#allocation2]  }
   0x3   :  { %s28_s16 = sshll.u32 %s311_s15, 4  ;;  %s18_s18 = sshll.u32 %s312_s17, 4  ;;  %s29_s16 = int_to_ptr.vmem [resolvable:$true] %s28_s16  ;;  %s19_s18 = int_to_ptr.vmem [resolvable:$true] %s18_s18 }
   0x4   :  { %s233_s19 = scalar_lea.vmem %s29_s16, 32  ;;  %p238_p1 = scmp.lt.s32.totalorder %s29_s16, %s29_s16 }
   0x5   :  { %p234_p0 = scmp.ne.s32.totalorder %s29_s16, %s233_s19  ;;  %p239_p2 = scmp.lt.s32.totalorder %s233_s19, %s233_s19 }
   0x7   :  { %p240_p3 = por %p239_p2, %p238_p1 }
   0x9   :  { %p241_p4 = pnand %p240_p3, %p234_p0 }
   0xb   :  { %244 = shalt.err (!%p241_p4)
}
   0xc   :  { %31 = dma.hbm_to_vmem [thread:$0]  %s367_s1, 32, %s29_s16, [#allocation6]  }
   0xd   :  { %s253_s22 = scalar_lea.vmem %s19_s18, 32  ;;  %p258_p6 = scmp.lt.s32.totalorder %s19_s18, %s19_s18 }
   0xe   :  { %p254_p5 = scmp.ne.s32.totalorder %s19_s18, %s253_s22  ;;  %p259_p7 = scmp.lt.s32.totalorder %s253_s22, %s253_s22 }
  0x10   :  { %p260_p8 = por %p259_p7, %p258_p6 }
  0x12   :  { %p261_p9 = pnand %p260_p8, %p254_p5 }
  0x14   :  { %264 = shalt.err (!%p261_p9)
}
  0x15   :  { %21 = dma.hbm_to_vmem [thread:$0]  %s366_s0, 32, %s19_s18, [#allocation3]  }
  0x16   :  { %s313_s25 = smov [#allocation7]  }
  0x17   :  { %s37_s26 = sshll.u32 %s313_s25, 4  ;;  %s38_s26 = int_to_ptr.vmem [resolvable:$true] %s37_s26 }
  0x18   :  { %s273_s27 = scalar_lea.vmem %s38_s26, 256  ;;  %p278_p11 = scmp.lt.s32.totalorder %s38_s26, %s38_s26 }
  0x19   :  { %p274_p10 = scmp.ne.s32.totalorder %s38_s26, %s273_s27  ;;  %p279_p12 = scmp.lt.s32.totalorder %s273_s27, %s273_s27 }
  0x1b   :  { %p280_p13 = por %p279_p12, %p278_p11 }
  0x1d   :  { %p281_p0 = pnand %p280_p13, %p274_p10 }
  0x1f   :  { %284 = shalt.err (!%p281_p0)
}
  0x20   :  { %s314_s1 = smov 64   ;;  %s315_s28 = smov 4  }
  0x21   :  { %43 = dma.hbm_to_vmem [thread:$0]  %s368_s2, 256, %s38_s26, [#allocation6], %s314_s1, %s314_s1, %s315_s28  }
  0x22   :  { %305 = dma.done.wait [#allocation3], 32  }
  0x23   :  { %306 = vsyncadd [#allocation3], 4294967264 }
  0x24   :  { %307 = dma.done.wait [#allocation6], 288  }
  0x25   :  { %308 = vsyncadd [#allocation6], 4294967008  ;;  %v316_v0 = vmov 0   ;;  %v317_v1 = vmov 2   ;;  %v56_v2 = vld [vmem:[#allocation2] sm:$0x3]  ;;  %v66_v8 = vlaneseq }
  0x26   :  { %218 = vset.pattern.permute.xlu0 %v316_v0  ;;  %220 = vset.pattern.permute.xlu1 %v317_v1  ;;  %v318_v3 = vmov 1   ;;  %v319_v4 = vmov 3   ;;  %v223_v5 = vld [vmem:[#allocation7 + $0x8] sm:$0xff]   ;;  %v320_v6 = vmov 0.0   ;;  %v224_v7 = vld [vmem:[#allocation7] sm:$0xff]   ;;  %vm321_vm0 = vmmov 0  }
  0x27   :  { %63 = vperm.xlu0 %218, %v56_v2   ;;  %87 = vperm.xlu1 %220, %v56_v2   ;;  %v67_v9 = vshrl.u32 %v66_v8, 7  ;;  %v59_v10 = vld [vmem:[#allocation5] sm:$0x3]  ;;  %v190_v21 = vld [vmem:[%s369_s3] ss:$0 sm:$0xff]  ;;  %vm128_vm1 = vcmask 261120  }
  0x28   :  { %198 = vmatprep.subr.bf16.mxu0 %v320_v6  ;;  %202 = vmatprep.mubr.msk.bf16.mxu0 %vm321_vm0, %v320_v6  ;;  %v60_v11 = vunpack.c.l.bf16 %v59_v10  ;;  %v191_v35 = vld [vmem:[%s369_s3 + $0x1] ss:$0 sm:$0xff]  ;;  %s322_s7 = smov [#allocation8]   ;;  %vm172_vm2 = vcmask 254976  }
  0x29   :  { %199 = vmatpush3.bf16.msra.mxu0 %v223_v5  ;;  %v68_v12 = vsub.s32 0, %v67_v9  ;;  %v82_v14 = vsub.s32 1, %v67_v9  ;;  %v92_v16 = vsub.s32 2, %v67_v9  ;;  %v102_v18 = vsub.s32 3, %v67_v9  ;;  %s180_s8 = sshll.u32 %s322_s7, 4  ;;  %s181_s8 = int_to_ptr.vmem [resolvable:$true] %s180_s8 }
  0x2a   :  { %200 = vmatprep.subr.bf16.mxu0 %v320_v6  ;;  %s285_s9 = scalar_lea.vmem %s181_s8, 32  ;;  %p290_p2 = scmp.lt.s32.totalorder %s181_s8, %s181_s8 }
  0x2b   :  { %219 = vset.pattern.permute.xlu0 %v318_v3  ;;  %221 = vset.pattern.permute.xlu1 %v319_v4  ;;  %v69_v13 = vrot.slane %v60_v11, %v68_v12  ;;  %v83_v20 = vrot.slane %v60_v11, %v82_v14  ;;  %v93_v22 = vrot.slane %v60_v11, %v92_v16  ;;  %p286_p1 = scmp.ne.s32.totalorder %s181_s8, %s285_s9  ;;  %p291_p3 = scmp.lt.s32.totalorder %s285_s9, %s285_s9 }
  0x2c   :  { %77 = vperm.xlu0 %219, %v56_v2   ;;  %97 = vperm.xlu1 %221, %v56_v2   ;;  %v103_v23 = vrot.slane %v60_v11, %v102_v18 }
  0x2d   :  { %201 = vmatpush3.bf16.msra.mxu0 %v224_v7  ;;  %p292_p4 = por %p291_p3, %p290_p2 }
  0x2f   :  { %p293_p5 = pnand %p292_p4, %p286_p1 }
  0x30   :  { %222 = vset.pattern.permute.xlu0 %v319_v4 }
  0xa2   :  { %v64_v15 = vpop.permute.xlu0 %63  ;;  %v88_v17 = vpop.permute.xlu1 %87 }
  0xa3   :  { %v70_v19 = vmul.f32 %v69_v13, %v64_v15  ;;  %v94_v28 = vmul.f32 %v93_v22, %v88_v17 }
  0xa5   :  { %v75_v26 = vadd.f32 %v190_v21, %v70_v19 }
  0xa7   :  { %v78_v24 = vpop.permute.xlu0 %77  ;;  %v98_v25 = vpop.permute.xlu1 %97 }
  0xa8   :  { %v84_v27 = vmul.f32 %v83_v20, %v78_v24  ;;  %v104_v30 = vmul.f32 %v103_v23, %v98_v25 }
  0xaa   :  { %v85_v29 = vadd.f32 %v84_v27, %v75_v26 }
  0xac   :  { %v95_v31 = vadd.f32 %v94_v28, %v85_v29 }
  0xae   :  { %v105_v32 = vadd.f32 %v104_v30, %v95_v31 }
  0xb0   :  { %v106_v33 = vmax.f32 %v105_v32, 0.0 }
  0xb2   :  { %v107_v34 = vpack.c.bf16 %v106_v33, %v106_v33 }
  0xb4   :  { %203 = vmatmul.mubr.msk.bf16.vlgmr.msra.gmra.mxu0 %vm128_vm1, %v107_v34 }
 0x174   :  { %v166_v36 = vpop.f32.mrf.mxu0 }
 0x175   :  { %v167_v37 = vadd.f32 %v191_v35, %v166_v36 }
 0x176   :  { %v204_v38 = vpop.f32.mrf.mxu0 }
 0x177   :  { %173 = vst.msk [vmem:[#allocation8] sm:$0x3] %vm172_vm2, %v167_v37 }
 0x178   :  { %v169_v39 = vpop.f32.mrf.mxu0 }
 0x179   :  { %296 = shalt.err (!%p293_p5)
}
 0x17a   :  { %183 = dma.vmem_to_hbm [thread:$0]  %s181_s8, 32, %s370_s4, [#allocation4]   ;;  %v205_v40 = vpop.f32.mrf.mxu0 }
 0x17b   :  { %309 = dma.done.wait [#allocation4], 32  }
 0x17c   :  { %310 = vsyncadd [#allocation4], 4294967264 }
 0x17d   :  { %187 = vsyncpa [#allocation3], 1 }
 0x17e   :  { %188 = vsyncpa [#allocation6], 1 }
 0x17f   :  { %189 = vsyncpa [#allocation4], 1 }

</bundles_post_ra>
